<compile_context>
chip_gen: v5e
topology: v5e:2x2
jax: 0.10.0
libtpu: 0.0.40
codegen_flags: <defaults>
</compile_context>

<pallas_src>
import functools

import jax
import jax.numpy as jnp
from jax.experimental import pallas as pl
from jax.experimental.pallas import tpu as pltpu


def _round_up(x, m):
    return ((x + m - 1) // m) * m


def _vmem_budget_bytes():
    try:
        cap = pltpu.get_tpu_info().vmem_capacity_bytes
    except Exception:  # conservative fallback (v7x-sized: 64 MiB per core)
        cap = 64 * 1024 * 1024
    return min(int(cap * 3 // 4), 100 * 1024 * 1024)


def _derive_i_tile(H, I, budget):
    """Largest I-tile whose double-buffered weight working set fits in VMEM."""
    # Fixed (weight-independent) VMEM: x (2 bufs, bf16) + out (2 bufs, <=4B) +
    # f32 accumulator, at the max token tile of 256.
    fixed = 256 * H * (2 * 2 + 2 * 4 + 4)
    cands = [c for c in (1024, 512, 256, 128) if c <= I and I % c == 0]
    if not cands:
        return I  # tiny I (tests): one full tile
    for c in cands:
        # per step: w13 tile 2*H*c*2B + w2 tile c*H*2B = 6*H*c, double-buffered
        if 12 * H * c + fixed <= budget:
            return c
    return cands[-1]


# ----------------------------- fused-MoE expert kernel ----------------------
def _moe_kernel(counts_ref, fetch_ref,            # SMEM scalar-prefetch tables
                x_ref, w13_ref, w2_ref, rw_ref,   # VMEM inputs
                out_ref, acc_ref):                # VMEM output + f32 scratch
    t = pl.program_id(0)
    i = pl.program_id(1)
    e = pl.program_id(2)
    del fetch_ref  # only consumed by the index_maps (DMA-level expert skip)

    @pl.when(jnp.logical_and(i == 0, e == 0))
    def _():
        acc_ref[...] = jnp.zeros_like(acc_ref)

    # Skip all MXU work when no token of this tile routes to expert e; the
    # fetch table in the weight index_maps already skipped the weight DMA.
    @pl.when(counts_ref[t, e] > 0)
    def _():
        x = x_ref[...]                                            # [tT, H] bf16
        g = jnp.dot(x, w13_ref[0], preferred_element_type=jnp.float32)
        u = jnp.dot(x, w13_ref[1], preferred_element_type=jnp.float32)
        act = (g * jax.nn.sigmoid(g)) * u                         # [tT, tI] f32
        act = act * rw_ref[...]                                   # fold routing wt
        acc_ref[...] += jnp.dot(act.astype(w2_ref.dtype), w2_ref[...],
                                preferred_element_type=jnp.float32)

    @pl.when(jnp.logical_and(i == pl.num_programs(1) - 1,
                             e == pl.num_programs(2) - 1))
    def _():
        out_ref[...] = acc_ref[...].astype(out_ref.dtype)


def fused_moe(x, w13, w2, rw, counts, fetch, *, out_dtype):
    """x: [Tp, H] bf16 (Tp = nT*tT); w13: [E*nI, 2, H, tI] bf16;
    w2: [E, I, H] bf16; rw: [E*nT, tT, 1] f32; counts/fetch: [nT, E] i32."""
    Tp, H = x.shape
    E, I, _ = w2.shape
    tI = w13.shape[-1]
    nI = w13.shape[0] // E
    nT = counts.shape[0]
    tT = Tp // nT

    budget = _vmem_budget_bytes()

    grid_spec = pltpu.PrefetchScalarGridSpec(
        num_scalar_prefetch=2,
        # Expert axis innermost so the fetch table can repeat weight block
        # indices across inactive experts (DMA elided by the pipeline).
        grid=(nT, nI, E),
        in_specs=[
            # x tile: constant across (i, e) -> resident, DMA'd once per t.
            pl.BlockSpec((tT, H), lambda t, i, e, cnt, fet: (t, 0)),
            # packed w1|w3 tile: one contiguous [2, H, tI] slab per step; the
            # fetch table repeats / pre-issues the next active expert's index.
            pl.BlockSpec((pl.Squeezed(), 2, H, tI),
                         lambda t, i, e, cnt, fet: (fet[t, e] * nI + i, 0, 0, 0)),
            # w2 tile [tI, H] (already contiguous inside [E, I, H]).
            pl.BlockSpec((pl.Squeezed(), tI, H),
                         lambda t, i, e, cnt, fet: (fet[t, e], i, 0)),
            # routing-weight column for (expert, token-tile) as a (tT, 1) block.
            pl.BlockSpec((pl.Squeezed(), tT, 1),
                         lambda t, i, e, cnt, fet: (fet[t, e] * nT + t, 0, 0)),
        ],
        out_specs=pl.BlockSpec((tT, H), lambda t, i, e, cnt, fet: (t, 0)),
        scratch_shapes=[pltpu.VMEM((tT, H), jnp.float32)],
    )
    return pl.pallas_call(
        _moe_kernel,
        out_shape=jax.ShapeDtypeStruct((Tp, H), out_dtype),
        grid_spec=grid_spec,
        compiler_params=pltpu.CompilerParams(
            dimension_semantics=("parallel", "arbitrary", "arbitrary"),
            vmem_limit_bytes=budget,
        ),
    )(counts, fetch, x, w13, w2, rw)


# ----------------------------- MixtralMoE forward ---------------------------
@functools.partial(jax.jit, static_argnames=("top_k",))
def mixtral_moe_forward(hidden_states, params, *, top_k):
    orig_shape = hidden_states.shape
    orig_dtype = hidden_states.dtype
    E, I, H = params["w2"].shape
    x = hidden_states.reshape(-1, H)
    T = x.shape[0]

    # ---- router: tiny GEMM + softmax -> top_k -> renormalize (XLA glue) ----
    logits = jnp.dot(x.astype(jnp.float32), params["wg"].astype(jnp.float32))
    probs = jax.nn.softmax(logits, axis=-1)
    topk_vals, topk_idx = jax.lax.top_k(probs, top_k)
    topk_vals = topk_vals / jnp.sum(topk_vals, axis=-1, keepdims=True)
    one_hot = topk_idx[..., None] == jnp.arange(E)[None, None, :]      # [T,K,E]
    routing = jnp.einsum("tk,tke->te", topk_vals,
                         one_hot.astype(jnp.float32))                  # [T,E]

    # ---- token tile: multiple of 16 (bf16 packing), <=256; pad T up --------
    tT = min(256, _round_up(T, 16))
    Tp = _round_up(T, tT)
    nT = Tp // tT
    pad = Tp - T
    x_p = jnp.pad(x, ((0, pad), (0, 0)))
    routing_p = jnp.pad(routing, ((0, pad), (0, 0)))
    one_hot_p = jnp.pad(one_hot, ((0, pad), (0, 0), (0, 0)))

    # per-(token-tile, expert) token counts -> in-kernel compute skip
    counts = jnp.sum(one_hot_p.reshape(nT, tT, top_k, E), axis=(1, 2),
                     dtype=jnp.int32)                                  # [nT,E]
    # "fetch" table: for every (tile, expert) step, the NEXT active expert (or
    # the last active one if none follows).  Inactive steps then repeat /
    # pre-issue the active expert's block index -> the weight DMA is elided.
    idx = jnp.arange(E, dtype=jnp.int32)[None, :]
    active = counts > 0
    nxt = jax.lax.cummin(jnp.where(active, idx, E), axis=1, reverse=True)
    prv = jax.lax.cummax(jnp.where(active, idx, -1), axis=1)
    fetch = jnp.where(nxt < E, nxt, jnp.maximum(prv, 0)).astype(jnp.int32)

    # routing weights as (tT, 1) column blocks addressed by (expert, tile)
    rw = routing_p.T.reshape(E * nT, tT)[..., None].astype(jnp.float32)

    # TODO(synk): f32 callers see bf16-level error (activations are cast to
    # bf16 to match the bf16 expert weights / MXU path of the vLLM module).
    out = fused_moe(x_p.astype(jnp.bfloat16), params["w13"], params["w2"],
                    rw, counts, fetch, out_dtype=orig_dtype)
    return out[:T].reshape(orig_shape)


# ----------------------------- param init / host-side weight prep -----------
def prepare_moe_weights(wg, w1, w3, w2):
    """One-time host-side prep.  w1/w3: [E, H, I]; w2: [E, I, H] (already
    transposed from the vLLM FusedMoE layout w13:[E,2I,H], w2:[E,H,I]).
    Packs w1|w3 into contiguous per-(expert, I-tile) blocks [E*nI, 2, H, tI]."""
    E, H, I = w1.shape
    tI = _derive_i_tile(H, I, _vmem_budget_bytes())
    nI = I // tI
    w1_t = w1.reshape(E, H, nI, tI).transpose(0, 2, 1, 3)   # [E, nI, H, tI]
    w3_t = w3.reshape(E, H, nI, tI).transpose(0, 2, 1, 3)
    w13 = jnp.stack([w1_t, w3_t], axis=2).reshape(E * nI, 2, H, tI)
    return {"wg": wg, "w13": w13, "w2": w2}


def init_raw_weights(key, num_experts, hidden_size, intermediate_size,
                     dtype=jnp.bfloat16):
    k1, k2, k3, k4 = jax.random.split(key, 4)
    wg = jax.random.normal(k1, (hidden_size, num_experts), jnp.float32) * 0.05
    w1 = (jax.random.normal(k2, (num_experts, hidden_size, intermediate_size),
                            jnp.float32) * 0.05).astype(dtype)
    w3 = (jax.random.normal(k3, (num_experts, hidden_size, intermediate_size),
                            jnp.float32) * 0.05).astype(dtype)
    w2 = (jax.random.normal(k4, (num_experts, intermediate_size, hidden_size),
                            jnp.float32) * 0.05).astype(dtype)
    return {"wg": wg, "w1": w1, "w3": w3, "w2": w2}


# ----------------------------- pure-XLA reference ---------------------------
def reference_moe(hidden_states, raw, top_k):
    orig_shape = hidden_states.shape
    E, H, I = raw["w1"].shape
    x = hidden_states.reshape(-1, H).astype(jnp.float32)
    logits = x @ raw["wg"].astype(jnp.float32)
    probs = jax.nn.softmax(logits, axis=-1)
    vals, idxs = jax.lax.top_k(probs, top_k)
    vals = vals / jnp.sum(vals, axis=-1, keepdims=True)
    one_hot = (idxs[..., None] == jnp.arange(E)[None, None, :]).astype(jnp.float32)
    routing = jnp.einsum("tk,tke->te", vals, one_hot)
    w1 = raw["w1"].astype(jnp.float32)
    w3 = raw["w3"].astype(jnp.float32)
    w2 = raw["w2"].astype(jnp.float32)
    g = jnp.einsum("th,ehi->tei", x, w1)
    u = jnp.einsum("th,ehi->tei", x, w3)
    act = (g * jax.nn.sigmoid(g)) * u
    part = jnp.einsum("tei,eih->teh", act, w2)
    out = jnp.einsum("te,teh->th", routing, part)
    return out.reshape(orig_shape)


if __name__ == "__main__":
    # small shapes consistent with the module
    num_experts = 8
    top_k = 2
    hidden_size = 32
    intermediate_size = 64
    batch, seq = 2, 8

    key = jax.random.PRNGKey(0)
    kp, kx = jax.random.split(key)
    raw = init_raw_weights(kp, num_experts, hidden_size, intermediate_size)
    params = prepare_moe_weights(**raw)
    hidden_states = jax.random.normal(
        kx, (batch, seq, hidden_size), jnp.float32).astype(jnp.bfloat16)

    out = mixtral_moe_forward(hidden_states, params, top_k=top_k)
    out = jax.block_until_ready(out)
    assert out.shape == hidden_states.shape
    assert out.dtype == hidden_states.dtype
    assert bool(jnp.all(jnp.isfinite(out.astype(jnp.float32))))

    ref = reference_moe(hidden_states, raw, top_k)
    err = float(jnp.max(jnp.abs(out.astype(jnp.float32) - ref)))
    assert err < 5e-3, f"max abs err vs reference: {err}"
    print("KERNEL_OK")
</pallas_src>

<mosaic_0001>
module attributes {stable_mosaic.version = 11 : i64} {
  func.func @_moe_kernel(%arg0: i32, %arg1: i32, %arg2: i32, %arg3: memref<1x8xi32, #tpu.memory_space<smem>>, %arg4: memref<1x8xi32, #tpu.memory_space<smem>>, %arg5: memref<16x32xbf16, #tpu.memory_space<vmem>>, %arg6: memref<1x2x32x64xbf16, #tpu.memory_space<vmem>>, %arg7: memref<1x64x32xbf16, #tpu.memory_space<vmem>>, %arg8: memref<1x16x1xf32, #tpu.memory_space<vmem>>, %arg9: memref<16x32xbf16, #tpu.memory_space<vmem>>, %arg10: memref<16x32xf32, #tpu.memory_space<vmem>>) attributes {dimension_semantics = [#tpu.dimension_semantics<parallel>, #tpu.dimension_semantics<arbitrary>, #tpu.dimension_semantics<arbitrary>], iteration_bounds = array<i64: 1, 1, 8>, scalar_prefetch = 2 : i64, scratch_operands = 1 : i64, tpu.core_type = #tpu.core_type<tc>, window_params = [{transform_indices = @transform_0, window_bounds = array<i64: 16, 32>}, {transform_indices = @transform_1, window_bounds = array<i64: 1, 2, 32, 64>}, {transform_indices = @transform_2, window_bounds = array<i64: 1, 64, 32>}, {transform_indices = @transform_3, window_bounds = array<i64: 1, 16, 1>}, {transform_indices = @transform_4, window_bounds = array<i64: 16, 32>}]} {
    %c0_i32 = arith.constant 0 : i32
    %0 = arith.cmpi eq, %arg1, %c0_i32 : i32
    %c0_i32_0 = arith.constant 0 : i32
    %1 = arith.cmpi eq, %arg2, %c0_i32_0 : i32
    %2 = arith.andi %0, %1 : i1
    %3 = arith.extui %2 : i1 to i32
    %c0_i32_1 = arith.constant 0 : i32
    %4 = arith.cmpi ne, %3, %c0_i32_1 : i32
    scf.if %4 {
      %cst = arith.constant 0.000000e+00 : f32
      %16 = vector.broadcast %cst : f32 to vector<16x32xf32>
      %c0 = arith.constant 0 : index
      %c0_6 = arith.constant 0 : index
      %17 = vector.load %arg10[%c0, %c0_6] : memref<16x32xf32, #tpu.memory_space<vmem>>, vector<16x32xf32>
      tpu.vector_store %arg10[%c0, %c0_6], %16 {strides = array<i32>} : memref<16x32xf32, #tpu.memory_space<vmem>>, vector<16x32xf32>,
    } else {
    }
    %5 = arith.index_cast %arg0 : i32 to index
    %6 = arith.index_cast %arg2 : i32 to index
    %7 = memref.load %arg3[%5, %6] : memref<1x8xi32, #tpu.memory_space<smem>>
    %c0_i32_2 = arith.constant 0 : i32
    %8 = arith.cmpi sgt, %7, %c0_i32_2 : i32
    %9 = arith.extui %8 : i1 to i32
    %c0_i32_3 = arith.constant 0 : i32
    %10 = arith.cmpi ne, %9, %c0_i32_3 : i32
    scf.if %10 {
      %c0 = arith.constant 0 : index
      %c0_6 = arith.constant 0 : index
      %16 = vector.load %arg5[%c0, %c0_6] : memref<16x32xbf16, #tpu.memory_space<vmem>>, vector<16x32xbf16>
      %c0_7 = arith.constant 0 : index
      %c0_8 = arith.constant 0 : index
      %c0_9 = arith.constant 0 : index
      %c0_10 = arith.constant 0 : index
      %17 = vector.load %arg6[%c0_7, %c0_8, %c0_9, %c0_10] : memref<1x2x32x64xbf16, #tpu.memory_space<vmem>>, vector<1x1x32x64xbf16>
      %18 = vector.shape_cast %17 : vector<1x1x32x64xbf16> to vector<32x64xbf16>
      %cst = arith.constant dense<0.000000e+00> : vector<16x64xf32>
      %19 = tpu.matmul %16, %18, %cst {dimension_numbers = #tpu.dot_dimension_numbers<[1], [0], [0], [1], [0, 0, 1, 1], [], []>} : vector<16x32xbf16>, vector<32x64xbf16>, vector<16x64xf32> -> vector<16x64xf32>
      %c0_11 = arith.constant 0 : index
      %c1 = arith.constant 1 : index
      %c0_12 = arith.constant 0 : index
      %c0_13 = arith.constant 0 : index
      %20 = vector.load %arg6[%c0_11, %c1, %c0_12, %c0_13] : memref<1x2x32x64xbf16, #tpu.memory_space<vmem>>, vector<1x1x32x64xbf16>
      %21 = vector.shape_cast %20 : vector<1x1x32x64xbf16> to vector<32x64xbf16>
      %cst_14 = arith.constant dense<0.000000e+00> : vector<16x64xf32>
      %22 = tpu.matmul %16, %21, %cst_14 {dimension_numbers = #tpu.dot_dimension_numbers<[1], [0], [0], [1], [0, 0, 1, 1], [], []>} : vector<16x32xbf16>, vector<32x64xbf16>, vector<16x64xf32> -> vector<16x64xf32>
      %23 = arith.negf %19 : vector<16x64xf32>
      %24 = math.exp %23 : vector<16x64xf32>
      %cst_15 = arith.constant 1.000000e+00 : f32
      %25 = vector.broadcast %cst_15 : f32 to vector<16x64xf32>
      %26 = arith.addf %25, %24 : vector<16x64xf32>
      %27 = arith.divf %25, %26 : vector<16x64xf32>
      %28 = arith.mulf %19, %27 : vector<16x64xf32>
      %29 = arith.mulf %28, %22 : vector<16x64xf32>
      %c0_16 = arith.constant 0 : index
      %c0_17 = arith.constant 0 : index
      %c0_18 = arith.constant 0 : index
      %30 = vector.load %arg8[%c0_16, %c0_17, %c0_18] : memref<1x16x1xf32, #tpu.memory_space<vmem>>, vector<1x16x1xf32>
      %31 = vector.shape_cast %30 : vector<1x16x1xf32> to vector<16x1xf32>
      %32 = vector.broadcast %31 : vector<16x1xf32> to vector<16x64xf32>
      %33 = arith.mulf %29, %32 : vector<16x64xf32>
      %c0_19 = arith.constant 0 : index
      %c0_20 = arith.constant 0 : index
      %34 = vector.load %arg10[%c0_19, %c0_20] : memref<16x32xf32, #tpu.memory_space<vmem>>, vector<16x32xf32>
      %35 = arith.truncf %33 : vector<16x64xf32> to vector<16x64xbf16>
      %c0_21 = arith.constant 0 : index
      %c0_22 = arith.constant 0 : index
      %c0_23 = arith.constant 0 : index
      %36 = vector.load %arg7[%c0_21, %c0_22, %c0_23] : memref<1x64x32xbf16, #tpu.memory_space<vmem>>, vector<1x64x32xbf16>
      %37 = vector.shape_cast %36 : vector<1x64x32xbf16> to vector<64x32xbf16>
      %cst_24 = arith.constant dense<0.000000e+00> : vector<16x32xf32>
      %38 = tpu.matmul %35, %37, %cst_24 {dimension_numbers = #tpu.dot_dimension_numbers<[1], [0], [0], [1], [0, 0, 1, 1], [], []>} : vector<16x64xbf16>, vector<64x32xbf16>, vector<16x32xf32> -> vector<16x32xf32>
      %39 = arith.addf %34, %38 : vector<16x32xf32>
      %c0_25 = arith.constant 0 : index
      %c0_26 = arith.constant 0 : index
      %40 = vector.load %arg10[%c0_25, %c0_26] : memref<16x32xf32, #tpu.memory_space<vmem>>, vector<16x32xf32>
      tpu.vector_store %arg10[%c0_25, %c0_26], %39 {strides = array<i32>} : memref<16x32xf32, #tpu.memory_space<vmem>>, vector<16x32xf32>,
    } else {
    }
    %c0_i32_4 = arith.constant 0 : i32
    %11 = arith.cmpi eq, %arg1, %c0_i32_4 : i32
    %c7_i32 = arith.constant 7 : i32
    %12 = arith.cmpi eq, %arg2, %c7_i32 : i32
    %13 = arith.andi %11, %12 : i1
    %14 = arith.extui %13 : i1 to i32
    %c0_i32_5 = arith.constant 0 : i32
    %15 = arith.cmpi ne, %14, %c0_i32_5 : i32
    scf.if %15 {
      %c0 = arith.constant 0 : index
      %c0_6 = arith.constant 0 : index
      %16 = vector.load %arg10[%c0, %c0_6] : memref<16x32xf32, #tpu.memory_space<vmem>>, vector<16x32xf32>
      %17 = arith.truncf %16 : vector<16x32xf32> to vector<16x32xbf16>
      %c0_7 = arith.constant 0 : index
      %c0_8 = arith.constant 0 : index
      %18 = vector.load %arg9[%c0_7, %c0_8] : memref<16x32xbf16, #tpu.memory_space<vmem>>, vector<16x32xbf16>
      tpu.vector_store %arg9[%c0_7, %c0_8], %17 {strides = array<i32>} : memref<16x32xbf16, #tpu.memory_space<vmem>>, vector<16x32xbf16>,
    } else {
    }
    return
  }
  func.func @transform_0(%arg0: i32, %arg1: i32, %arg2: i32, %arg3: memref<1x8xi32, #tpu.memory_space<smem>>, %arg4: memref<1x8xi32, #tpu.memory_space<smem>>) -> (i32, i32) {
    %c0_i32 = arith.constant 0 : i32
    %c0_i32_0 = arith.constant 0 : i32
    return %arg0, %c0_i32 : i32, i32
  }
  func.func @transform_1(%arg0: i32, %arg1: i32, %arg2: i32, %arg3: memref<1x8xi32, #tpu.memory_space<smem>>, %arg4: memref<1x8xi32, #tpu.memory_space<smem>>) -> (i32, i32, i32, i32) {
    %0 = arith.index_cast %arg0 : i32 to index
    %1 = arith.index_cast %arg2 : i32 to index
    %2 = memref.load %arg4[%0, %1] : memref<1x8xi32, #tpu.memory_space<smem>>
    %c1_i32 = arith.constant 1 : i32
    %3 = arith.muli %2, %c1_i32 : i32
    %4 = arith.addi %3, %arg1 : i32
    %c0_i32 = arith.constant 0 : i32
    %c0_i32_0 = arith.constant 0 : i32
    %c0_i32_1 = arith.constant 0 : i32
    %c0_i32_2 = arith.constant 0 : i32
    return %4, %c0_i32, %c0_i32_0, %c0_i32_1 : i32, i32, i32, i32
  }
  func.func @transform_2(%arg0: i32, %arg1: i32, %arg2: i32, %arg3: memref<1x8xi32, #tpu.memory_space<smem>>, %arg4: memref<1x8xi32, #tpu.memory_space<smem>>) -> (i32, i32, i32) {
    %0 = arith.index_cast %arg0 : i32 to index
    %1 = arith.index_cast %arg2 : i32 to index
    %2 = memref.load %arg4[%0, %1] : memref<1x8xi32, #tpu.memory_space<smem>>
    %c0_i32 = arith.constant 0 : i32
    %c0_i32_0 = arith.constant 0 : i32
    return %2, %arg1, %c0_i32 : i32, i32, i32
  }
  func.func @transform_3(%arg0: i32, %arg1: i32, %arg2: i32, %arg3: memref<1x8xi32, #tpu.memory_space<smem>>, %arg4: memref<1x8xi32, #tpu.memory_space<smem>>) -> (i32, i32, i32) {
    %0 = arith.index_cast %arg0 : i32 to index
    %1 = arith.index_cast %arg2 : i32 to index
    %2 = memref.load %arg4[%0, %1] : memref<1x8xi32, #tpu.memory_space<smem>>
    %c1_i32 = arith.constant 1 : i32
    %3 = arith.muli %2, %c1_i32 : i32
    %4 = arith.addi %3, %arg0 : i32
    %c0_i32 = arith.constant 0 : i32
    %c0_i32_0 = arith.constant 0 : i32
    %c0_i32_1 = arith.constant 0 : i32
    return %4, %c0_i32, %c0_i32_0 : i32, i32, i32
  }
  func.func @transform_4(%arg0: i32, %arg1: i32, %arg2: i32, %arg3: memref<1x8xi32, #tpu.memory_space<smem>>, %arg4: memref<1x8xi32, #tpu.memory_space<smem>>) -> (i32, i32) {
    %c0_i32 = arith.constant 0 : i32
    %c0_i32_0 = arith.constant 0 : i32
    return %arg0, %c0_i32 : i32, i32
  }
}

</mosaic_0001>

<bundles_post_ra>
// kernel: mixtral_moe_forward.1
= control target key start
LH: loop header
LB: loop body
LE: loop exit
PB: predicated region body
PF: predicated region fallthrough
CT: control target
= control target key end

     0   :  { %s1030_s27 = smov [#allocation4]   ;;  %s1031_s28 = smov [#allocation5]   ;;  %s1141_s0 = inlined_call_operand.vmem [shape: s32[1,8], index: 0, kind: input, shape index: {}]   ;;  %s1142_s2 = inlined_call_operand.vmem [shape: bf16[16,32], index: 2, kind: input, shape index: {}]   ;;  %s1143_s3 = inlined_call_operand.vmem [shape: bf16[8,2,32,64], index: 3, kind: input, shape index: {}]   ;;  %s1144_s4 = inlined_call_operand.vmem [shape: bf16[8,64,32], index: 4, kind: input, shape index: {}]   ;;  %s1145_s5 = inlined_call_operand.vmem [shape: f32[8,16,1], index: 5, kind: input, shape index: {}]   ;;  %s1146_s6 = inlined_call_operand.hbm [shape: bf16[16,32], index: 6, kind: output, shape index: {}]   ;;  %s1147_s1 = inlined_call_operand.vmem [shape: s32[1,8], index: 1, kind: input, shape index: {}]  }
   0x1   :  { %s12_s23 = sshll.u32 %s1141_s0, 4  ;;  %s17_s26 = sshll.u32 %s1147_s1, 4  ;;  %s13_s23 = int_to_ptr.vmem [resolvable:$true] %s12_s23  ;;  %s18_s26 = int_to_ptr.vmem [resolvable:$true] %s17_s26 }
   0x2   :  { %15 = dma.vmem_to_smem %s13_s23, 16, %s1030_s27, [#allocation3] }
   0x3   :  { %20 = dma.vmem_to_smem %s18_s26, 16, %s1031_s28, [#allocation3] }
   0x4   :  { %1012 = dma.done.wait [#allocation3], 32 }
   0x5   :  { %1013 = vsyncadd [#allocation3], 4294967264 }
   0x6   :  { %23 = sfence }
   0x7   :  { %24 = vsyncpa [#allocation7], 0  ;;  %s1078_s29 = smov 0   ;;  %s1080_s30 = smov 0  }
   0x8   :  { %s1082_s7 = smov 0  }
   0x9 LB: > { %s815_s0 = sadd.s32 4294967295, %s1028_s7   ;;  %s42_s1 = sadd.s32 1, %s1024_s30  ;;  %s1028_s7 = sphi %s1082_s7, %s30_s7   ;;  %s1024_s30 = sphi %s1080_s30, %s1149_s30   ;;  %s1020_s29 = sphi %s1078_s29, %s1148_s29  }
   0xa   : > { %p43_p0 = scmp.ge.s32.totalorder %s42_s1, 8  ;;  %p825_p1 = scmp.ge.s32.totalorder %s1028_s7, 1 }
   0xb   : > { %p339_p2 = scmp.lt.s32.totalorder %s1028_s7, 9 }
   0xc   : > { %s1151_s1 = smov (%p43_p0, %s42_s1), 0 }
   0xd   : > { %p340_p3 = pnand %p825_p1, %p339_p2 }
   0xe   : > { %s411_s8 = sshra.s32 (!%p340_p3), %s1020_s29, 7  ;;  %s416_s9 = sand.u32 (!%p340_p3), 127, %s1020_s29 }
   0xf   : > { %343 = sbr.rel (%p340_p3) target bundleno = 384 (0x180), region = 36  ;;  %s826_s10 = sshll.u32 (!%p340_p3), %s411_s8, 7 }
  0x10   : > { %p486_p4 = scmp.eq.s32.totalorder (!%p340_p3), %s1020_s29, 0  ;;  %s417_s11 = sadd.s32 (!%p340_p3), %s826_s10, %s416_s9 }
  0x11   : > { %s418_s12 = sld [smem:[#allocation5 + %s417_s11]] (!%p340_p3) }
  0x12   : > { %s441_s13 = sld [smem:[#allocation5 + %s417_s11]] (!%p340_p3) }
  0x13   : > { %s467_s14 = sld [smem:[#allocation5 + %s417_s11]] (!%p340_p3) }
  0x14   : > { %vm491_vm0 = vcmask (%p486_p4), 261120   ;;  %v1032_v0 = vmov (%p486_p4), 0.0  }
  0x15   : > { %492 = vst.msk [vmem:[#allocation2] sm:$0xff] (%p486_p4), %vm491_vm0, %v1032_v0 }
  0x16   : > { %493 = vst.msk [vmem:[#allocation2 + $0x8] sm:$0xff] (%p486_p4), %vm491_vm0, %v1032_v0 }
  0x17   : > { %p420_p5 = scmp.lt.s32.totalorder %s418_s12, 7 }
  0x18   : > { %p443_p6 = scmp.lt.s32.totalorder %s441_s13, 7 }
  0x19   : > { %s1153_s12 = smov (!%p420_p5, %s418_s12), 7  ;;  %p469_p7 = scmp.lt.s32.totalorder %s467_s14, 7 }
  0x1a   : > { %s1155_s13 = smov (!%p443_p6, %s441_s13), 7  ;;  %s888_s15 = sshll.u32 %s1153_s12, 5 }
  0x1b   : > { %s424_s18 = scalar_lea.vmem %s1143_s3, %s888_s15  ;;  %s889_s19 = sshll.u32 %s1155_s13, 5 }
  0x1c   : > { %s1108_s22 = scalar_lea.vmem %s1144_s4, %s889_s19  ;;  %s1157_s14 = smov (!%p469_p7, %s467_s14), 7 }
  0x1d   : > { %s890_s23 = sshll.u32 %s1157_s14, 4  ;;  %490 = sbr.rel (!%p486_p4) target bundleno = 34 (0x22), region = 40 }
  0x1e   : > { %s473_s26 = scalar_lea.vmem %s1145_s5, %s890_s23 }
  0x22 PF: > { %s501_s27 = sld [smem:[#allocation4 + %s417_s11]] }
  0x28   : > { %p837_p8 = scmp.le.s32.totalorder %s501_s27, 0 }
  0x2a   : > { %505 = sbr.rel (%p837_p8) target bundleno = 368 (0x170), region = 44 }
  0x2f   : > { %v894_v1 = vld [vmem:[%s424_s18 + $0x8] sm:$0xff]  ;;  %v896_v2 = vld [vmem:[%s424_s18 + $0x18] sm:$0xff]  ;;  %v1033_v3 = vmov 0   ;;  %v620_v4 = vld [vmem:[%s473_s26] sm:$0xff]  ;;  %vm529_vm1 = vcmask 261120   ;;  %vm669_vm10 = vcmask 523264  }
  0x30   : > { %939 = vset.pattern.permute.xlu0 %v1033_v3  ;;  %539 = vmatpush.bf16.msra.mxu0 %v894_v1  ;;  %v893_v5 = vld [vmem:[%s424_s18] sm:$0xff]  ;;  %v895_v6 = vld [vmem:[%s424_s18 + $0x10] sm:$0xff]  ;;  %v621_v8 = vld [vmem:[%s473_s26 + $0x8] sm:$0xff] }
  0x31   : > { %624 = vperm.xlu0 %939, %v620_v4   ;;  %570 = vmatpush.bf16.msra.mxu1 %v896_v2  ;;  %v892_v7 = vld [vmem:[%s1142_s2] sm:$0xff]  ;;  %v900_v9 = vld [vmem:[%s1108_s22 + $0x18] sm:$0xff]  ;;  %v899_v11 = vld [vmem:[%s1108_s22 + $0x10] sm:$0xff] }
  0x32   : > { %677 = vmatpush.bf16.msra.mxu2 %v900_v9  ;;  %v898_v13 = vld [vmem:[%s1108_s22 + $0x8] sm:$0xff]  ;;  %v897_v15 = vld [vmem:[%s1108_s22] sm:$0xff] }
  0x33   : > { %v634_v52 = vld [vmem:[#allocation2] sm:$0xff]  ;;  %v635_v55 = vld [vmem:[#allocation2 + $0x8] sm:$0xff] }
  0x34   : > { %540 = vmatpush.bf16.msra.mxu0 %v893_v5 }
  0x35   : > { %571 = vmatpush.bf16.msra.mxu1 %v895_v6 }
  0x36   : > { %678 = vmatpush.bf16.msra.mxu2 %v899_v11 }
  0x37   : > { %850 = vmatmul.msk.bf16.vlgmr.msra.gmra.mxu0 %vm529_vm1, %v892_v7 }
  0x38   : > { %863 = vmatmul.msk.bf16.vlgmr.msra.gmra.mxu1 %vm529_vm1, %v892_v7 }
  0x39   : > { %629 = vperm.xlu0 %939, %v621_v8  }
  0x3a   : > { %679 = vmatpush.bf16.msra.mxu2 %v898_v13 }
  0x3e   : > { %680 = vmatpush.bf16.msra.mxu2 %v897_v15 }
  0xa3   : > { %v625_v36 = vpop.permute.xlu0 %624 }
  0xab   : > { %v630_v48 = vpop.permute.xlu0 %629 }
  0xb4   : > { %v542_v10 = vpop.f32.mrf.mxu0 }
  0xb5   : > { %v864_v12 = vmul.f32 -1.442695, %v542_v10  ;;  %v573_v32 = vpop.f32.mrf.mxu1 }
  0xb7   : > { %940 = vpow2.f32 %v864_v12 }
  0xbc   : > { %v544_v14 = vpop.f32.mrf.mxu0 }
  0xbd   : > { %v941_v16 = vpop.eup %940  ;;  %v865_v17 = vmul.f32 -1.442695, %v544_v14  ;;  %v575_v46 = vpop.f32.mrf.mxu1 }
  0xbe   : > { %v584_v18 = vadd.f32 1.0, %v941_v16 }
  0xbf   : > { %942 = vpow2.f32 %v865_v17 }
  0xc0   : > { %944 = vrcp.f32 %v584_v18  ;;  %v597_v25 = vand.u32 2147483648, %v584_v18  ;;  %vm591_vm3 = vweird.f32 %v584_v18  ;;  %v595_v27 = vand.u32 2147483647, %v584_v18 }
  0xc2   : > { %v598_v31 = vor.u32 1.1754944e-38, %v597_v25  ;;  %vm596_vm5 = vcmp.eq.f32.partialorder %v595_v27, 8.507059e+37 }
  0xc5   : > { %v943_v19 = vpop.eup %942 }
  0xc6   : > { %v945_v20 = vpop.eup %944  ;;  %v585_v21 = vadd.f32 1.0, %v943_v19 }
  0xc7   : > { %v587_v22 = vmul.f32 %v945_v20, %v584_v18  ;;  %vm592_vm2 = vweird.f32 %v945_v20 }
  0xc8   : > { %946 = vrcp.f32 %v585_v21  ;;  %vm593_vm4 = vmor %vm591_vm3, %vm592_vm2  ;;  %v612_v35 = vand.u32 2147483648, %v585_v21  ;;  %v610_v38 = vand.u32 2147483647, %v585_v21  ;;  %vm606_vm7 = vweird.f32 %v585_v21 }
  0xc9   : > { %v588_v23 = vsub.f32 1.0, %v587_v22 }
  0xca   : > { %v613_v41 = vor.u32 1.1754944e-38, %v612_v35  ;;  %vm611_vm9 = vcmp.eq.f32.partialorder %v610_v38, 8.507059e+37 }
  0xcb   : > { %v589_v24 = vmul.f32 %v945_v20, %v588_v23 }
  0xcd   : > { %v590_v26 = vadd.f32 %v945_v20, %v589_v24 }
  0xce   : > { %v947_v28 = vpop.eup %946 }
  0xcf   : > { %v594_v29 = vsel %vm593_vm4, %v945_v20, %v590_v26  ;;  %v602_v30 = vmul.f32 %v947_v28, %v585_v21  ;;  %vm607_vm6 = vweird.f32 %v947_v28 }
  0xd0   : > { %v599_v34 = vsel %vm596_vm5, %v598_v31, %v594_v29  ;;  %vm608_vm8 = vmor %vm606_vm7, %vm607_vm6 }
  0xd1   : > { %v603_v33 = vsub.f32 1.0, %v602_v30  ;;  %v616_v39 = vmul.f32 %v599_v34, %v542_v10 }
  0xd3   : > { %v604_v37 = vmul.f32 %v947_v28, %v603_v33  ;;  %v618_v45 = vmul.f32 %v616_v39, %v573_v32 }
  0xd5   : > { %v605_v40 = vadd.f32 %v947_v28, %v604_v37  ;;  %v632_v49 = vmul.f32 %v625_v36, %v618_v45 }
  0xd7   : > { %v609_v42 = vsel %vm608_vm8, %v947_v28, %v605_v40 }
  0xd8   : > { %v614_v43 = vsel %vm611_vm9, %v613_v41, %v609_v42 }
  0xd9   : > { %v617_v44 = vmul.f32 %v614_v43, %v544_v14 }
  0xdb   : > { %v619_v47 = vmul.f32 %v617_v44, %v575_v46 }
  0xdd   : > { %v633_v50 = vmul.f32 %v630_v48, %v619_v47 }
  0xdf   : > { %v636_v51 = vpack.c.bf16 %v633_v50, %v632_v49 }
  0xe1   : > { %882 = vmatmul.msk.bf16.vlgmr.msra.gmra.mxu2 %vm669_vm10, %v636_v51 }
 0x164   : > { %v682_v53 = vpop.f32.mrf.mxu2 }
 0x165   : > { %v687_v54 = vadd.f32 %v682_v53, %v634_v52 }
 0x167   : > { %689 = vst.msk [vmem:[#allocation2] sm:$0xff] %vm529_vm1, %v687_v54 }
 0x16c   : > { %v684_v56 = vpop.f32.mrf.mxu2 }
 0x16d   : > { %v688_v57 = vadd.f32 %v684_v56, %v635_v55 }
 0x16f   : > { %690 = vst.msk [vmem:[#allocation2 + $0x8] sm:$0xff] %vm529_vm1, %v688_v57 }
 0x170 PF: > { %p691_p9 = scmp.eq.s32.totalorder %s1020_s29, 7 }
 0x171   : > { %v696_v58 = vld [vmem:[#allocation2] sm:$0xff] (%p691_p9)  ;;  %vm700_vm11 = vcmask (%p691_p9), 257024  }
 0x172   : > { %695 = sbr.rel (!%p691_p9) target bundleno = 378 (0x17a), region = 48  ;;  %v698_v60 = vpack.c.bf16 (%p691_p9), %v696_v58, %v696_v58 }
 0x174   : > { %701 = vst.msk [vmem:[#allocation6] sm:$0xf] (%p691_p9), %vm700_vm11, %v698_v60 }
 0x176   : > { %v697_v59 = vld [vmem:[#allocation2 + $0x8] sm:$0xff] (%p691_p9) }
 0x177   : > { %v699_v61 = vpack.c.bf16 %v697_v59, %v697_v59 }
 0x179   : > { %702 = vst.msk [vmem:[#allocation6 + $0x4] sm:$0xf] %vm700_vm11, %v699_v61 }
 0x17a PF: > { %p906_p10 = scmp.eq.s32.totalorder %s815_s0, 7  ;;  %s713_s11 = sshll.u32 %s1146_s6, 4  ;;  %s714_s11 = int_to_ptr.hbm [resolvable:$true] %s713_s11 }
 0x17b   : > { %s1034_s12 = smov [#allocation6]   ;;  %s1035_s29 = smov 64  }
 0x17c   : > { %s711_s13 = sshll.u32 %s1034_s12, 4  ;;  %s1036_s14 = smov 4   ;;  %s712_s13 = int_to_ptr.vmem [resolvable:$true] %s711_s13 }
 0x17d   : > { %903 = dma.vmem_to_hbm [thread:$0]  (%p906_p10), %s712_s13, 128, %s714_s11, [#allocation7], %s1035_s29, %s1035_s29, %s1036_s14  }
 0x17e   : > { %1015 = dma.done.wait (%p906_p10), [#allocation7], 128  }
 0x17f   : > { %1017 = vsyncadd (%p906_p10), [#allocation7], 4294967168 }
 0x180 PF: > { %s30_s7 = sadd.s32 1, %s1028_s7   ;;  %s1148_s29 = smov %s1024_s30 }
 0x181   : > { %p27_p11 = scmp.ge.s32.totalorder %s30_s7, 10   ;;  %s1149_s30 = smov %s1151_s1 }
 0x183   :  { %29 = sbr.rel (!%p27_p11) target bundleno = 9 (0x9), region = 86 }
 0x188   :  { %730 = vsyncpa [#allocation7], 1 }
 0x189   :  { %732 = vsyncpa [#allocation7 + $0x1], 1 }

</bundles_post_ra>
